<compile_context>
chip_gen: v5e
topology: v5e:2x2
jax: 0.10.0
libtpu: 0.0.40
codegen_flags: <defaults>
</compile_context>

<pallas_src>
import jax
import jax.numpy as jnp
from jax.experimental import pallas as pl
from jax.experimental.pallas import tpu as pltpu

IN_DIM, HID_DIM, OUT_DIM = 4, 16, 2
N_LAYERS = 5
D = 32        # padded feature width (>= HID_DIM + 1 bias channel)
BIAS = 16     # reserved lane index carrying the constant-1.0 "ones" channel


def _mlp_kernel(x_ref, w_ref, o_ref):
    # x_ref : (B, D)      activations; col BIAS == 1.0, other pad cols == 0
    # w_ref : (5, D, D)   per-layer augmented weights (bias folded into row BIAS)
    # o_ref : (B, D)      padded output; cols 0..OUT_DIM-1 are the real logits
    h = x_ref[...]
    # 4 hidden layers with ReLU (bias rides along via the reserved ones channel;
    # relu(1) == 1, so it self-propagates layer to layer).
    for i in range(N_LAYERS - 1):
        h = jnp.maximum(
            jnp.dot(h, w_ref[i], preferred_element_type=jnp.float32), 0.0)
    # Final layer: no activation.
    o_ref[...] = jnp.dot(
        h, w_ref[N_LAYERS - 1], preferred_element_type=jnp.float32
    ).astype(o_ref.dtype)


def _augment_input(x):
    """Pad [B, 4] -> [B, D] with zeros and set the ones channel."""
    B = x.shape[0]
    x_aug = jnp.zeros((B, D), jnp.float32)
    x_aug = x_aug.at[:, : x.shape[1]].set(x.astype(jnp.float32))
    x_aug = x_aug.at[:, BIAS].set(1.0)
    return x_aug


@jax.jit
def forward_model_pallas(x, packed_w):
    """x: [B, 4] float32.  packed_w: [5, D, D] float32 (from pack_params)."""
    B = x.shape[0]
    x_aug = _augment_input(x)

    cost = pl.CostEstimate(
        flops=2 * B * D * D * N_LAYERS,
        transcendentals=0,
        bytes_accessed=4 * (x_aug.size + packed_w.size + B * D),
    )

    vmem_spec = pl.BlockSpec(memory_space=pltpu.MemorySpace.VMEM)
    out_pad = pl.pallas_call(
        _mlp_kernel,
        out_shape=jax.ShapeDtypeStruct((B, D), jnp.float32),
        in_specs=[vmem_spec, vmem_spec],
        out_specs=vmem_spec,
        cost_estimate=cost,
    )(x_aug, packed_w)
    return out_pad[:, :OUT_DIM]


def init_params(key):
    """Deterministic init mirroring nn.Linear shapes (weights stored as [in, out])."""
    dims = [(IN_DIM, HID_DIM)] + [(HID_DIM, HID_DIM)] * 3 + [(HID_DIM, OUT_DIM)]
    params = []
    for d_in, d_out in dims:
        kw, kb, key = jax.random.split(key, 3)
        bound = 1.0 / (d_in ** 0.5)  # same range as PyTorch default init
        w = jax.random.uniform(kw, (d_in, d_out), jnp.float32, -bound, bound)
        b = jax.random.uniform(kb, (d_out,), jnp.float32, -bound, bound)
        params.append((w, b))
    return params


def pack_params(params):
    """Pack (W, b) pairs into one (5, D, D) slab with bias folded in."""
    slabs = []
    for w, b in params:
        d_in, d_out = w.shape
        m = jnp.zeros((D, D), jnp.float32)
        m = m.at[:d_in, :d_out].set(w)       # weight block
        m = m.at[BIAS, :d_out].set(b)        # bias row (picked up by ones channel)
        m = m.at[BIAS, BIAS].set(1.0)        # keep the ones channel alive
        slabs.append(m)
    return jnp.stack(slabs)                  # (5, D, D)


def forward_model_ref(x, params):
    """Plain-JAX reference for correctness checking."""
    h = x
    for w, b in params[:-1]:
        h = jnp.maximum(h @ w + b, 0.0)
    w, b = params[-1]
    return h @ w + b


if __name__ == "__main__":
    key = jax.random.PRNGKey(0)
    kx, kp = jax.random.split(key)

    batch = 8
    x = jax.random.normal(kx, (batch, IN_DIM), jnp.float32)
    params = init_params(kp)
    packed_w = pack_params(params)

    out = forward_model_pallas(x, packed_w)
    out = jax.block_until_ready(out)

    ref = forward_model_ref(x, params)
    assert out.shape == (batch, OUT_DIM), out.shape
    assert jnp.allclose(out, ref, atol=1e-5, rtol=1e-5), \
        f"mismatch: max abs err {jnp.max(jnp.abs(out - ref))}"

    print("KERNEL_OK")
</pallas_src>

<mosaic_0001>
module attributes {stable_mosaic.version = 11 : i64} {
  func.func @_mlp_kernel(%arg0: memref<8x32xf32, #tpu.memory_space<vmem>>, %arg1: memref<5x32x32xf32, #tpu.memory_space<vmem>>, %arg2: memref<8x32xf32, #tpu.memory_space<vmem>>) attributes {dimension_semantics = [], scalar_prefetch = 0 : i64, scratch_operands = 0 : i64, tpu.core_type = #tpu.core_type<tc>} {
    %c0 = arith.constant 0 : index
    %c0_0 = arith.constant 0 : index
    %0 = vector.load %arg0[%c0, %c0_0] : memref<8x32xf32, #tpu.memory_space<vmem>>, vector<8x32xf32>
    %c0_1 = arith.constant 0 : index
    %c0_2 = arith.constant 0 : index
    %c0_3 = arith.constant 0 : index
    %1 = vector.load %arg1[%c0_1, %c0_2, %c0_3] : memref<5x32x32xf32, #tpu.memory_space<vmem>>, vector<1x32x32xf32>
    %2 = vector.shape_cast %1 : vector<1x32x32xf32> to vector<32x32xf32>
    %cst = arith.constant dense<0.000000e+00> : vector<8x32xf32>
    %3 = tpu.matmul %0, %2, %cst {dimension_numbers = #tpu.dot_dimension_numbers<[1], [0], [0], [1], [0, 0, 1, 1], [], []>} : vector<8x32xf32>, vector<32x32xf32>, vector<8x32xf32> -> vector<8x32xf32>
    %cst_4 = arith.constant 0.000000e+00 : f32
    %4 = vector.broadcast %cst_4 : f32 to vector<8x32xf32>
    %5 = arith.maximumf %3, %4 : vector<8x32xf32>
    %c1 = arith.constant 1 : index
    %c0_5 = arith.constant 0 : index
    %c0_6 = arith.constant 0 : index
    %6 = vector.load %arg1[%c1, %c0_5, %c0_6] : memref<5x32x32xf32, #tpu.memory_space<vmem>>, vector<1x32x32xf32>
    %7 = vector.shape_cast %6 : vector<1x32x32xf32> to vector<32x32xf32>
    %cst_7 = arith.constant dense<0.000000e+00> : vector<8x32xf32>
    %8 = tpu.matmul %5, %7, %cst_7 {dimension_numbers = #tpu.dot_dimension_numbers<[1], [0], [0], [1], [0, 0, 1, 1], [], []>} : vector<8x32xf32>, vector<32x32xf32>, vector<8x32xf32> -> vector<8x32xf32>
    %cst_8 = arith.constant 0.000000e+00 : f32
    %9 = vector.broadcast %cst_8 : f32 to vector<8x32xf32>
    %10 = arith.maximumf %8, %9 : vector<8x32xf32>
    %c2 = arith.constant 2 : index
    %c0_9 = arith.constant 0 : index
    %c0_10 = arith.constant 0 : index
    %11 = vector.load %arg1[%c2, %c0_9, %c0_10] : memref<5x32x32xf32, #tpu.memory_space<vmem>>, vector<1x32x32xf32>
    %12 = vector.shape_cast %11 : vector<1x32x32xf32> to vector<32x32xf32>
    %cst_11 = arith.constant dense<0.000000e+00> : vector<8x32xf32>
    %13 = tpu.matmul %10, %12, %cst_11 {dimension_numbers = #tpu.dot_dimension_numbers<[1], [0], [0], [1], [0, 0, 1, 1], [], []>} : vector<8x32xf32>, vector<32x32xf32>, vector<8x32xf32> -> vector<8x32xf32>
    %cst_12 = arith.constant 0.000000e+00 : f32
    %14 = vector.broadcast %cst_12 : f32 to vector<8x32xf32>
    %15 = arith.maximumf %13, %14 : vector<8x32xf32>
    %c3 = arith.constant 3 : index
    %c0_13 = arith.constant 0 : index
    %c0_14 = arith.constant 0 : index
    %16 = vector.load %arg1[%c3, %c0_13, %c0_14] : memref<5x32x32xf32, #tpu.memory_space<vmem>>, vector<1x32x32xf32>
    %17 = vector.shape_cast %16 : vector<1x32x32xf32> to vector<32x32xf32>
    %cst_15 = arith.constant dense<0.000000e+00> : vector<8x32xf32>
    %18 = tpu.matmul %15, %17, %cst_15 {dimension_numbers = #tpu.dot_dimension_numbers<[1], [0], [0], [1], [0, 0, 1, 1], [], []>} : vector<8x32xf32>, vector<32x32xf32>, vector<8x32xf32> -> vector<8x32xf32>
    %cst_16 = arith.constant 0.000000e+00 : f32
    %19 = vector.broadcast %cst_16 : f32 to vector<8x32xf32>
    %20 = arith.maximumf %18, %19 : vector<8x32xf32>
    %c4 = arith.constant 4 : index
    %c0_17 = arith.constant 0 : index
    %c0_18 = arith.constant 0 : index
    %21 = vector.load %arg1[%c4, %c0_17, %c0_18] : memref<5x32x32xf32, #tpu.memory_space<vmem>>, vector<1x32x32xf32>
    %22 = vector.shape_cast %21 : vector<1x32x32xf32> to vector<32x32xf32>
    %cst_19 = arith.constant dense<0.000000e+00> : vector<8x32xf32>
    %23 = tpu.matmul %20, %22, %cst_19 {dimension_numbers = #tpu.dot_dimension_numbers<[1], [0], [0], [1], [0, 0, 1, 1], [], []>} : vector<8x32xf32>, vector<32x32xf32>, vector<8x32xf32> -> vector<8x32xf32>
    %c0_20 = arith.constant 0 : index
    %c0_21 = arith.constant 0 : index
    %24 = vector.load %arg2[%c0_20, %c0_21] : memref<8x32xf32, #tpu.memory_space<vmem>>, vector<8x32xf32>
    tpu.vector_store %arg2[%c0_20, %c0_21], %23 {strides = array<i32>} : memref<8x32xf32, #tpu.memory_space<vmem>>, vector<8x32xf32>,
    return
  }
}

</mosaic_0001>

<bundles_post_ra>
// kernel: forward_model_pallas.1
= control target key start
LH: loop header
LB: loop body
LE: loop exit
PB: predicated region body
PF: predicated region fallthrough
CT: control target
= control target key end

     0   :  { %7 = vsyncpa [#allocation3], 0  ;;  %s212_s12 = smov [#allocation2]   ;;  %s213_s14 = smov 128   ;;  %s245_s0 = inlined_call_operand.vmem [shape: f32[8,32], index: 0, kind: input, shape index: {}]   ;;  %s246_s1 = inlined_call_operand.hbm [shape: f32[5,32,32], index: 1, kind: input, shape index: {}]   ;;  %s247_s2 = inlined_call_operand.vmem [shape: f32[8,32], index: 2, kind: output, shape index: {}]  }
   0x1   :  { %s14_s11 = sshll.u32 %s246_s1, 4  ;;  %s16_s13 = sshll.u32 %s212_s12, 4  ;;  %s15_s11 = int_to_ptr.hbm [resolvable:$true] %s14_s11  ;;  %s17_s13 = int_to_ptr.vmem [resolvable:$true] %s16_s13 }
   0x2   :  { %s214_s15 = smov 8  }
   0x3   :  { %22 = dma.hbm_to_vmem [thread:$0]  %s15_s11, 2560, %s17_s13, [#allocation3], %s213_s14, %s213_s14, %s214_s15  }
   0x4   :  { %210 = dma.done.wait [#allocation3], 2560  }
   0x5   :  { %211 = vsyncadd [#allocation3], 4294964736  ;;  %v31_v0 = vld [vmem:[#allocation2 + $0x18] sm:$0xff]  ;;  %v30_v1 = vld [vmem:[#allocation2 + $0x10] sm:$0xff]  ;;  %vm32_vm0 = vcmask 261120  }
   0x6   :  { %48 = vmatpush.msra.mxu0 %v31_v0  ;;  %v61_v2 = vld [vmem:[#allocation2 + $0x38] sm:$0xff]  ;;  %v29_v3 = vld [vmem:[#allocation2 + $0x8] sm:$0xff]  ;;  %v60_v4 = vld [vmem:[#allocation2 + $0x30] sm:$0xff] }
   0x7   :  { %77 = vmatpush.msra.mxu1 %v61_v2  ;;  %v28_v5 = vld [vmem:[#allocation2] sm:$0xff]  ;;  %v59_v7 = vld [vmem:[#allocation2 + $0x28] sm:$0xff]  ;;  %v90_v9 = vld [vmem:[#allocation2 + $0x58] sm:$0xff] }
   0x8   :  { %49 = vmatpush.msra.mxu0 %v30_v1  ;;  %v27_v6 = vld [vmem:[%s245_s0] sm:$0xff]  ;;  %v89_v10 = vld [vmem:[#allocation2 + $0x50] sm:$0xff]  ;;  %106 = vmatpush.msra.mxu2 %v90_v9  ;;  %v88_v13 = vld [vmem:[#allocation2 + $0x48] sm:$0xff] }
   0x9   :  { %78 = vmatpush.msra.mxu1 %v60_v4  ;;  %v58_v8 = vld [vmem:[#allocation2 + $0x20] sm:$0xff]  ;;  %v119_v15 = vld [vmem:[#allocation2 + $0x78] sm:$0xff]  ;;  %v118_v16 = vld [vmem:[#allocation2 + $0x70] sm:$0xff] }
   0xa   :  { %50 = vmatpush.msra.mxu0 %v29_v3  ;;  %107 = vmatpush.msra.mxu2 %v89_v10  ;;  %v87_v14 = vld [vmem:[#allocation2 + $0x40] sm:$0xff]  ;;  %v117_v19 = vld [vmem:[#allocation2 + $0x68] sm:$0xff]  ;;  %v148_v21 = vld [vmem:[#allocation2 + $0x98] sm:$0xff] }
   0xb   :  { %79 = vmatpush.msra.mxu1 %v59_v7  ;;  %135 = vmatpush.msra.mxu3 %v119_v15  ;;  %v116_v20 = vld [vmem:[#allocation2 + $0x60] sm:$0xff]  ;;  %v147_v22 = vld [vmem:[#allocation2 + $0x90] sm:$0xff]  ;;  %v146_v23 = vld [vmem:[#allocation2 + $0x88] sm:$0xff] }
   0xc   :  { %51 = vmatpush.msra.mxu0 %v28_v5  ;;  %108 = vmatpush.msra.mxu2 %v88_v13  ;;  %v145_v26 = vld [vmem:[#allocation2 + $0x80] sm:$0xff] }
   0xd   :  { %178 = vmatmul.msk.f32.vlgmr.msra.gmra.mxu0 %vm32_vm0, %v27_v6  ;;  %80 = vmatpush.msra.mxu1 %v58_v8 }
   0xe   :  { %109 = vmatpush.msra.mxu2 %v87_v14  ;;  %136 = vmatpush.msra.mxu3 %v118_v16 }
   0xf   :  { %164 = vmatpush.msrb.mxu0 %v148_v21 }
  0x10   :  { %137 = vmatpush.msra.mxu3 %v117_v19 }
  0x11   :  { %165 = vmatpush.msrb.mxu0 %v147_v22 }
  0x12   :  { %138 = vmatpush.msra.mxu3 %v116_v20 }
  0x13   :  { %166 = vmatpush.msrb.mxu0 %v146_v23 }
  0x15   :  { %167 = vmatpush.msrb.mxu0 %v145_v26 }
  0x8a   :  { %v53_v11 = vpop.f32.mrf.mxu0 }
  0x8b   :  { %v56_v12 = vmax.f32 %v53_v11, 0.0 }
  0x8d   :  { %179 = vmatmul.msk.f32.vlgmr.msra.gmra.mxu1 %vm32_vm0, %v56_v12 }
 0x10a   :  { %v82_v17 = vpop.f32.mrf.mxu1 }
 0x10b   :  { %v85_v18 = vmax.f32 %v82_v17, 0.0 }
 0x10d   :  { %180 = vmatmul.msk.f32.vlgmr.msra.gmra.mxu2 %vm32_vm0, %v85_v18 }
 0x190   :  { %v111_v24 = vpop.f32.mrf.mxu2 }
 0x191   :  { %v114_v25 = vmax.f32 %v111_v24, 0.0 }
 0x193   :  { %181 = vmatmul.msk.f32.vlgmr.msra.gmra.mxu3 %vm32_vm0, %v114_v25 }
 0x216   :  { %v140_v27 = vpop.f32.mrf.mxu3 }
 0x217   :  { %v143_v28 = vmax.f32 %v140_v27, 0.0 }
 0x219   :  { %182 = vmatmul.msk.f32.vlgmr.msrb.gmra.mxu0 %vm32_vm0, %v143_v28 }
 0x296   :  { %v169_v29 = vpop.f32.mrf.mxu0 }
 0x297   :  { %172 = vst.msk [vmem:[%s247_s2] sm:$0xff] %vm32_vm0, %v169_v29 }
 0x298   :  { %177 = vsyncpa [#allocation3], 1 }

</bundles_post_ra>
